<compile_context>
chip_gen: v5e
topology: v5e:2x2
jax: 0.10.0
libtpu: 0.0.40
codegen_flags: <defaults>
</compile_context>

<pallas_src>
import jax
import jax.numpy as jnp
from jax import lax
from jax.experimental import pallas as pl
from jax.experimental.pallas import tpu as pltpu


DMA_DEPTH = 8          # row-fetch DMAs kept in flight per grid step


def _round_up(x, m):
    return ((x + m - 1) // m) * m


# ---------------------------------------------------------------------------
# Kernel 1: fused gather + FC.
#   out[i*TB + r] = table[ids[i*TB + r]] @ W^T + b
# ids live in SMEM (scalar prefetch); the table stays in HBM and rows are
# fetched with manual DMAs (depth-DMA_DEPTH ring); W^T and b are resident in
# VMEM; one (TB, D) @ (D, D) MXU matmul per grid step.
# ---------------------------------------------------------------------------
def _gather_project_kernel(ids_ref, table_hbm, w_ref, b_ref, out_ref,
                           rows_ref, sems):
    tb = out_ref.shape[0]
    base = pl.program_id(0) * tb

    def start_fetch(r, slot):
        row = ids_ref[base + r]
        pltpu.make_async_copy(table_hbm.at[pl.ds(row, 1), :],
                              rows_ref.at[pl.ds(r, 1), :],
                              sems.at[slot]).start()

    # Prime the ring: up to DMA_DEPTH row fetches in flight.
    for d in range(min(DMA_DEPTH, tb)):
        start_fetch(d, d)

    def body(r, carry):
        slot = r % DMA_DEPTH
        # Wait for row r (wait only needs matching byte count + semaphore).
        pltpu.make_async_copy(table_hbm.at[pl.ds(0, 1), :],
                              rows_ref.at[pl.ds(r, 1), :],
                              sems.at[slot]).wait()

        @pl.when(r + DMA_DEPTH < tb)
        def _():
            start_fetch(r + DMA_DEPTH, slot)

        return carry

    lax.fori_loop(0, tb, body, 0)

    prod = jnp.dot(rows_ref[...], w_ref[...],
                   preferred_element_type=jnp.float32)
    out_ref[...] = (prod + b_ref[...]).astype(out_ref.dtype)


def _gather_project(ids, table, fc_w, fc_b, *, tb=128):
    """Fused `fc(embedding(ids))` without materializing a projected table."""
    n = ids.shape[0]
    v, d = table.shape
    tb = min(tb, _round_up(n, 8))
    tb = _round_up(tb, 8)
    n_pad = pl.cdiv(n, tb) * tb
    if n_pad != n:
        ids = jnp.pad(ids, (0, n_pad - n))          # pad rows are discarded
    w_t = jnp.transpose(fc_w)                        # one-time, outside kernel
    b2 = fc_b.reshape(1, d)

    itemsize = jnp.dtype(table.dtype).itemsize
    cost = pl.CostEstimate(
        flops=2 * n_pad * d * d,
        transcendentals=0,
        bytes_accessed=itemsize * (2 * n_pad * d + d * d + d) + 4 * n_pad)

    out = pl.pallas_call(
        _gather_project_kernel,
        out_shape=jax.ShapeDtypeStruct((n_pad, d), table.dtype),
        grid_spec=pltpu.PrefetchScalarGridSpec(
            num_scalar_prefetch=1,
            grid=(n_pad // tb,),
            in_specs=[
                pl.BlockSpec(memory_space=pl.ANY),            # table (HBM)
                pl.BlockSpec((d, d), lambda i, ids: (0, 0)),  # W^T resident
                pl.BlockSpec((1, d), lambda i, ids: (0, 0)),  # bias resident
            ],
            out_specs=pl.BlockSpec((tb, d), lambda i, ids: (i, 0)),
            scratch_shapes=[
                pltpu.VMEM((tb, d), table.dtype),
                pltpu.SemaphoreType.DMA((DMA_DEPTH,)),
            ]),
        compiler_params=pltpu.CompilerParams(
            dimension_semantics=("parallel",)),   # split N across TCs on v7x
        cost_estimate=cost,
    )(ids, table, w_t, b2)
    return out[:n] if n_pad != n else out


# ---------------------------------------------------------------------------
# Kernel 2: pure batched row gather from a precomputed projected table.
# Rows are DMA'd directly into the pipelined (TB, D) output block.
# ---------------------------------------------------------------------------
def _gather_rows_kernel(ids_ref, table_hbm, out_ref, sems):
    tb = out_ref.shape[0]
    base = pl.program_id(0) * tb

    def start_fetch(r, slot):
        row = ids_ref[base + r]
        pltpu.make_async_copy(table_hbm.at[pl.ds(row, 1), :],
                              out_ref.at[pl.ds(r, 1), :],
                              sems.at[slot]).start()

    for d in range(min(DMA_DEPTH, tb)):
        start_fetch(d, d)

    def body(r, carry):
        slot = r % DMA_DEPTH
        pltpu.make_async_copy(table_hbm.at[pl.ds(0, 1), :],
                              out_ref.at[pl.ds(r, 1), :],
                              sems.at[slot]).wait()

        @pl.when(r + DMA_DEPTH < tb)
        def _():
            start_fetch(r + DMA_DEPTH, slot)

        return carry

    lax.fori_loop(0, tb, body, 0)


def _gather_rows(table_proj, ids, *, tb=128):
    vp, d = table_proj.shape
    n = ids.shape[0]
    tb = min(tb, _round_up(n, 8))
    tb = _round_up(tb, 8)
    n_pad = pl.cdiv(n, tb) * tb
    if n_pad != n:
        ids = jnp.pad(ids, (0, n_pad - n))

    itemsize = jnp.dtype(table_proj.dtype).itemsize
    cost = pl.CostEstimate(
        flops=0, transcendentals=0,
        bytes_accessed=itemsize * 2 * n_pad * d + 4 * n_pad)

    out = pl.pallas_call(
        _gather_rows_kernel,
        out_shape=jax.ShapeDtypeStruct((n_pad, d), table_proj.dtype),
        grid_spec=pltpu.PrefetchScalarGridSpec(
            num_scalar_prefetch=1,
            grid=(n_pad // tb,),
            in_specs=[pl.BlockSpec(memory_space=pl.ANY)],     # table_proj (HBM)
            out_specs=pl.BlockSpec((tb, d), lambda i, ids: (i, 0)),
            scratch_shapes=[pltpu.SemaphoreType.DMA((DMA_DEPTH,))]),
        compiler_params=pltpu.CompilerParams(
            dimension_semantics=("parallel",)),
        cost_estimate=cost,
    )(ids, table_proj)
    return out[:n] if n_pad != n else out


# ---------------------------------------------------------------------------
# Kernel 3 (optional precompute): table_proj = table @ W^T + b, tiled over V.
# Only worth it when table_proj is reused across many calls.
# ---------------------------------------------------------------------------
def _project_table_kernel(table_ref, w_ref, b_ref, out_ref):
    prod = jnp.dot(table_ref[...], w_ref[...],
                   preferred_element_type=jnp.float32)
    out_ref[...] = (prod + b_ref[...]).astype(out_ref.dtype)


def project_table(table, fc_w, fc_b, *, tile_v=None):
    v, d = table.shape
    itemsize = jnp.dtype(table.dtype).itemsize
    if tile_v is None:
        # Keep resident W (+bias) + double-buffered in/out tiles under ~12 MiB
        # so it fits v5e's 16 MiB scoped-VMEM default and v7x's 32 MiB default.
        budget = 12 * 1024 * 1024
        resident = (2 * d * d + 2 * d) * itemsize
        per_row = 4 * d * itemsize
        tile_v = max(8, min(1024, (max(budget - resident, per_row * 8))
                            // per_row))
        tile_v = max(8, (tile_v // 8) * 8)
        # TODO(synk): for very large D (>= 2048 f32) also tile W's output dim
        # (extra grid axis) or cast W to bf16 instead of shrinking tile_v.
    if v <= tile_v:
        tile_v = v                       # block == full array -> always legal
        v_pad = v
    else:
        v_pad = pl.cdiv(v, tile_v) * tile_v
        if v_pad != v:
            # Padded rows project to `b` only and are never gathered
            # (the wrapper clamps ids against the ORIGINAL vocab size).
            table = jnp.pad(table, ((0, v_pad - v), (0, 0)))
    w_t = jnp.transpose(fc_w)            # one-time transpose outside the grid
    b2 = fc_b.reshape(1, d)

    cost = pl.CostEstimate(
        flops=2 * v_pad * d * d,
        transcendentals=0,
        bytes_accessed=itemsize * (2 * v_pad * d + d * d + d))

    return pl.pallas_call(
        _project_table_kernel,
        out_shape=jax.ShapeDtypeStruct((v_pad, d), table.dtype),
        grid=(v_pad // tile_v,),
        in_specs=[
            pl.BlockSpec((tile_v, d), lambda i: (i, 0)),   # table tile
            pl.BlockSpec((d, d), lambda i: (0, 0)),        # W^T (resident)
            pl.BlockSpec((1, d), lambda i: (0, 0)),        # bias (resident)
        ],
        out_specs=pl.BlockSpec((tile_v, d), lambda i: (i, 0)),
        compiler_params=pltpu.CompilerParams(
            dimension_semantics=("parallel",)),
        cost_estimate=cost,
    )(table, w_t, b2)


# ---------------------------------------------------------------------------
# Public wrapper mirroring NodeEmbeddingPrep.forward(ids, adj, layer_idx)
# ---------------------------------------------------------------------------
def node_embedding_prep(ids, table, fc_w, fc_b, *, n_nodes, layer_idx=0,
                        table_proj=None, tb=128):
    """ids: (N,) int; table: (n_nodes+1, D); fc_w: (D, D) PyTorch (out, in);
    fc_b: (D,).  Returns (N, D) == fc(embedding(ids'))."""
    n = ids.shape[0]
    v, d = table.shape

    if layer_idx <= 0:
        # ids.clone().zero_() + n_nodes -> every output row is identical.
        # Gather+project the single row once and broadcast in the wrapper.
        one = jnp.array([n_nodes], dtype=jnp.int32)
        if table_proj is not None:
            row = _gather_rows(table_proj, one, tb=tb)
        else:
            row = _gather_project(one, table, fc_w, fc_b, tb=tb)
        return jnp.broadcast_to(row, (n, d))

    # TODO(synk): PyTorch nn.Embedding raises on out-of-range ids; we clamp
    # against the ORIGINAL (unpadded) vocab size for DMA safety.
    eff_ids = jnp.clip(ids.astype(jnp.int32), 0, v - 1)

    if table_proj is not None:
        # FC already folded into table_proj; per-call work is a pure gather.
        return _gather_rows(table_proj, eff_ids, tb=tb)

    # No precomputed projection: fused gather + FC (no full-vocab GEMM).
    return _gather_project(eff_ids, table, fc_w, fc_b, tb=tb)


if __name__ == "__main__":
    # Small, deterministic setup consistent with the module.
    n_nodes = 16
    embedding_dim = 64
    N = 12  # number of ids in the batch (exercises padding to a tile of 16)

    key = jax.random.PRNGKey(0)
    k_emb, k_w, k_b, k_ids = jax.random.split(key, 4)

    # nn.Embedding default init: N(0, 1)
    table = jax.random.normal(k_emb, (n_nodes + 1, embedding_dim), jnp.float32)
    # nn.Linear default init: U(-1/sqrt(in), 1/sqrt(in))
    bound = 1.0 / jnp.sqrt(embedding_dim)
    fc_w = jax.random.uniform(k_w, (embedding_dim, embedding_dim),
                              jnp.float32, -bound, bound)
    fc_b = jax.random.uniform(k_b, (embedding_dim,), jnp.float32, -bound, bound)

    ids = jax.random.randint(k_ids, (N,), 0, n_nodes, dtype=jnp.int32)
    adj = None  # unused by forward, kept for signature parity

    # layer_idx == 0 path (all ids -> n_nodes), fused gather+FC of one row.
    out0 = node_embedding_prep(ids, table, fc_w, fc_b,
                               n_nodes=n_nodes, layer_idx=0)
    # layer_idx > 0 path, fused gather+FC (default batched tile).
    out1 = node_embedding_prep(ids, table, fc_w, fc_b,
                               n_nodes=n_nodes, layer_idx=1)
    # Same path with a tiny tile to exercise a multi-step gather grid.
    out1b = node_embedding_prep(ids, table, fc_w, fc_b,
                                n_nodes=n_nodes, layer_idx=1, tb=8)
    # Amortized path: precompute table_proj once, then pure DMA gather.
    tp = project_table(table, fc_w, fc_b)
    out2 = node_embedding_prep(ids, table, fc_w, fc_b,
                               n_nodes=n_nodes, layer_idx=1, table_proj=tp)
    jax.block_until_ready((out0, out1, out1b, out2))

    # Pure-JAX reference check
    ref0 = table[jnp.full((N,), n_nodes)] @ fc_w.T + fc_b
    ref1 = table[ids] @ fc_w.T + fc_b
    assert out0.shape == (N, embedding_dim)
    assert out1.shape == (N, embedding_dim)
    assert jnp.allclose(out0, ref0, atol=1e-4, rtol=1e-4)
    assert jnp.allclose(out1, ref1, atol=1e-4, rtol=1e-4)
    assert jnp.allclose(out1b, ref1, atol=1e-4, rtol=1e-4)
    assert jnp.allclose(out2, ref1, atol=1e-4, rtol=1e-4)

    print("KERNEL_OK")
</pallas_src>

<mosaic_0001>
module attributes {stable_mosaic.version = 11 : i64} {
  func.func @_gather_project_kernel(%arg0: i32, %arg1: memref<8xi32, #tpu.memory_space<smem>>, %arg2: memref<17x64xf32, #tpu.memory_space<any>>, %arg3: memref<64x64xf32, #tpu.memory_space<vmem>>, %arg4: memref<1x64xf32, #tpu.memory_space<vmem>>, %arg5: memref<8x64xf32, #tpu.memory_space<vmem>>, %arg6: memref<8x64xf32, #tpu.memory_space<vmem>>, %arg7: memref<8x!tpu.dma_semaphore, #tpu.memory_space<semaphore_mem>>) attributes {dimension_semantics = [#tpu.dimension_semantics<parallel>], iteration_bounds = array<i64: 1>, scalar_prefetch = 1 : i64, scratch_operands = 2 : i64, tpu.core_type = #tpu.core_type<tc>, window_params = [{}, {pipeline_mode = #tpu.pipeline_mode<synchronous>, transform_indices = @transform_1, window_bounds = array<i64: 64, 64>}, {pipeline_mode = #tpu.pipeline_mode<synchronous>, transform_indices = @transform_2, window_bounds = array<i64: 1, 64>}, {transform_indices = @transform_3, window_bounds = array<i64: 8, 64>}]} {
    %c8_i32 = arith.constant 8 : i32
    %0 = arith.muli %arg0, %c8_i32 : i32
    %c0_i32 = arith.constant 0 : i32
    %1 = arith.addi %0, %c0_i32 : i32
    %2 = arith.index_cast %1 : i32 to index
    %3 = memref.load %arg1[%2] : memref<8xi32, #tpu.memory_space<smem>>
    %c0_i32_0 = arith.constant 0 : i32
    %c0_i32_1 = arith.constant 0 : i32
    %4 = tpu.memref_slice %arg2[%3, %c0_i32_1] : memref<17x64xf32, #tpu.memory_space<any>> -> memref<1x64xf32, #tpu.memory_space<any>>
    %c0_i32_2 = arith.constant 0 : i32
    %c0_i32_3 = arith.constant 0 : i32
    %5 = tpu.memref_slice %arg6[%c0_i32_2, %c0_i32_3] : memref<8x64xf32, #tpu.memory_space<vmem>> -> memref<1x64xf32, #tpu.memory_space<vmem>>
    %6 = tpu.memref_slice %arg7[%c0_i32_0] : memref<8x!tpu.dma_semaphore, #tpu.memory_space<semaphore_mem>> -> memref<1x!tpu.dma_semaphore, #tpu.memory_space<semaphore_mem>>
    %7 = tpu.memref_squeeze %6 : memref<1x!tpu.dma_semaphore, #tpu.memory_space<semaphore_mem>> -> memref<!tpu.dma_semaphore, #tpu.memory_space<semaphore_mem>>
    tpu.enqueue_dma source(%4 : memref<1x64xf32, #tpu.memory_space<any>>) target(%5 : memref<1x64xf32, #tpu.memory_space<vmem>>) target_semaphore(%7 : memref<!tpu.dma_semaphore, #tpu.memory_space<semaphore_mem>>)
    %c1_i32 = arith.constant 1 : i32
    %8 = arith.addi %0, %c1_i32 : i32
    %9 = arith.index_cast %8 : i32 to index
    %10 = memref.load %arg1[%9] : memref<8xi32, #tpu.memory_space<smem>>
    %c1_i32_4 = arith.constant 1 : i32
    %c0_i32_5 = arith.constant 0 : i32
    %11 = tpu.memref_slice %arg2[%10, %c0_i32_5] : memref<17x64xf32, #tpu.memory_space<any>> -> memref<1x64xf32, #tpu.memory_space<any>>
    %c1_i32_6 = arith.constant 1 : i32
    %c0_i32_7 = arith.constant 0 : i32
    %12 = tpu.memref_slice %arg6[%c1_i32_6, %c0_i32_7] : memref<8x64xf32, #tpu.memory_space<vmem>> -> memref<1x64xf32, #tpu.memory_space<vmem>>
    %13 = tpu.memref_slice %arg7[%c1_i32_4] : memref<8x!tpu.dma_semaphore, #tpu.memory_space<semaphore_mem>> -> memref<1x!tpu.dma_semaphore, #tpu.memory_space<semaphore_mem>>
    %14 = tpu.memref_squeeze %13 : memref<1x!tpu.dma_semaphore, #tpu.memory_space<semaphore_mem>> -> memref<!tpu.dma_semaphore, #tpu.memory_space<semaphore_mem>>
    tpu.enqueue_dma source(%11 : memref<1x64xf32, #tpu.memory_space<any>>) target(%12 : memref<1x64xf32, #tpu.memory_space<vmem>>) target_semaphore(%14 : memref<!tpu.dma_semaphore, #tpu.memory_space<semaphore_mem>>)
    %c2_i32 = arith.constant 2 : i32
    %15 = arith.addi %0, %c2_i32 : i32
    %16 = arith.index_cast %15 : i32 to index
    %17 = memref.load %arg1[%16] : memref<8xi32, #tpu.memory_space<smem>>
    %c2_i32_8 = arith.constant 2 : i32
    %c0_i32_9 = arith.constant 0 : i32
    %18 = tpu.memref_slice %arg2[%17, %c0_i32_9] : memref<17x64xf32, #tpu.memory_space<any>> -> memref<1x64xf32, #tpu.memory_space<any>>
    %c2_i32_10 = arith.constant 2 : i32
    %c0_i32_11 = arith.constant 0 : i32
    %19 = tpu.memref_slice %arg6[%c2_i32_10, %c0_i32_11] : memref<8x64xf32, #tpu.memory_space<vmem>> -> memref<1x64xf32, #tpu.memory_space<vmem>>
    %20 = tpu.memref_slice %arg7[%c2_i32_8] : memref<8x!tpu.dma_semaphore, #tpu.memory_space<semaphore_mem>> -> memref<1x!tpu.dma_semaphore, #tpu.memory_space<semaphore_mem>>
    %21 = tpu.memref_squeeze %20 : memref<1x!tpu.dma_semaphore, #tpu.memory_space<semaphore_mem>> -> memref<!tpu.dma_semaphore, #tpu.memory_space<semaphore_mem>>
    tpu.enqueue_dma source(%18 : memref<1x64xf32, #tpu.memory_space<any>>) target(%19 : memref<1x64xf32, #tpu.memory_space<vmem>>) target_semaphore(%21 : memref<!tpu.dma_semaphore, #tpu.memory_space<semaphore_mem>>)
    %c3_i32 = arith.constant 3 : i32
    %22 = arith.addi %0, %c3_i32 : i32
    %23 = arith.index_cast %22 : i32 to index
    %24 = memref.load %arg1[%23] : memref<8xi32, #tpu.memory_space<smem>>
    %c3_i32_12 = arith.constant 3 : i32
    %c0_i32_13 = arith.constant 0 : i32
    %25 = tpu.memref_slice %arg2[%24, %c0_i32_13] : memref<17x64xf32, #tpu.memory_space<any>> -> memref<1x64xf32, #tpu.memory_space<any>>
    %c3_i32_14 = arith.constant 3 : i32
    %c0_i32_15 = arith.constant 0 : i32
    %26 = tpu.memref_slice %arg6[%c3_i32_14, %c0_i32_15] : memref<8x64xf32, #tpu.memory_space<vmem>> -> memref<1x64xf32, #tpu.memory_space<vmem>>
    %27 = tpu.memref_slice %arg7[%c3_i32_12] : memref<8x!tpu.dma_semaphore, #tpu.memory_space<semaphore_mem>> -> memref<1x!tpu.dma_semaphore, #tpu.memory_space<semaphore_mem>>
    %28 = tpu.memref_squeeze %27 : memref<1x!tpu.dma_semaphore, #tpu.memory_space<semaphore_mem>> -> memref<!tpu.dma_semaphore, #tpu.memory_space<semaphore_mem>>
    tpu.enqueue_dma source(%25 : memref<1x64xf32, #tpu.memory_space<any>>) target(%26 : memref<1x64xf32, #tpu.memory_space<vmem>>) target_semaphore(%28 : memref<!tpu.dma_semaphore, #tpu.memory_space<semaphore_mem>>)
    %c4_i32 = arith.constant 4 : i32
    %29 = arith.addi %0, %c4_i32 : i32
    %30 = arith.index_cast %29 : i32 to index
    %31 = memref.load %arg1[%30] : memref<8xi32, #tpu.memory_space<smem>>
    %c4_i32_16 = arith.constant 4 : i32
    %c0_i32_17 = arith.constant 0 : i32
    %32 = tpu.memref_slice %arg2[%31, %c0_i32_17] : memref<17x64xf32, #tpu.memory_space<any>> -> memref<1x64xf32, #tpu.memory_space<any>>
    %c4_i32_18 = arith.constant 4 : i32
    %c0_i32_19 = arith.constant 0 : i32
    %33 = tpu.memref_slice %arg6[%c4_i32_18, %c0_i32_19] : memref<8x64xf32, #tpu.memory_space<vmem>> -> memref<1x64xf32, #tpu.memory_space<vmem>>
    %34 = tpu.memref_slice %arg7[%c4_i32_16] : memref<8x!tpu.dma_semaphore, #tpu.memory_space<semaphore_mem>> -> memref<1x!tpu.dma_semaphore, #tpu.memory_space<semaphore_mem>>
    %35 = tpu.memref_squeeze %34 : memref<1x!tpu.dma_semaphore, #tpu.memory_space<semaphore_mem>> -> memref<!tpu.dma_semaphore, #tpu.memory_space<semaphore_mem>>
    tpu.enqueue_dma source(%32 : memref<1x64xf32, #tpu.memory_space<any>>) target(%33 : memref<1x64xf32, #tpu.memory_space<vmem>>) target_semaphore(%35 : memref<!tpu.dma_semaphore, #tpu.memory_space<semaphore_mem>>)
    %c5_i32 = arith.constant 5 : i32
    %36 = arith.addi %0, %c5_i32 : i32
    %37 = arith.index_cast %36 : i32 to index
    %38 = memref.load %arg1[%37] : memref<8xi32, #tpu.memory_space<smem>>
    %c5_i32_20 = arith.constant 5 : i32
    %c0_i32_21 = arith.constant 0 : i32
    %39 = tpu.memref_slice %arg2[%38, %c0_i32_21] : memref<17x64xf32, #tpu.memory_space<any>> -> memref<1x64xf32, #tpu.memory_space<any>>
    %c5_i32_22 = arith.constant 5 : i32
    %c0_i32_23 = arith.constant 0 : i32
    %40 = tpu.memref_slice %arg6[%c5_i32_22, %c0_i32_23] : memref<8x64xf32, #tpu.memory_space<vmem>> -> memref<1x64xf32, #tpu.memory_space<vmem>>
    %41 = tpu.memref_slice %arg7[%c5_i32_20] : memref<8x!tpu.dma_semaphore, #tpu.memory_space<semaphore_mem>> -> memref<1x!tpu.dma_semaphore, #tpu.memory_space<semaphore_mem>>
    %42 = tpu.memref_squeeze %41 : memref<1x!tpu.dma_semaphore, #tpu.memory_space<semaphore_mem>> -> memref<!tpu.dma_semaphore, #tpu.memory_space<semaphore_mem>>
    tpu.enqueue_dma source(%39 : memref<1x64xf32, #tpu.memory_space<any>>) target(%40 : memref<1x64xf32, #tpu.memory_space<vmem>>) target_semaphore(%42 : memref<!tpu.dma_semaphore, #tpu.memory_space<semaphore_mem>>)
    %c6_i32 = arith.constant 6 : i32
    %43 = arith.addi %0, %c6_i32 : i32
    %44 = arith.index_cast %43 : i32 to index
    %45 = memref.load %arg1[%44] : memref<8xi32, #tpu.memory_space<smem>>
    %c6_i32_24 = arith.constant 6 : i32
    %c0_i32_25 = arith.constant 0 : i32
    %46 = tpu.memref_slice %arg2[%45, %c0_i32_25] : memref<17x64xf32, #tpu.memory_space<any>> -> memref<1x64xf32, #tpu.memory_space<any>>
    %c6_i32_26 = arith.constant 6 : i32
    %c0_i32_27 = arith.constant 0 : i32
    %47 = tpu.memref_slice %arg6[%c6_i32_26, %c0_i32_27] : memref<8x64xf32, #tpu.memory_space<vmem>> -> memref<1x64xf32, #tpu.memory_space<vmem>>
    %48 = tpu.memref_slice %arg7[%c6_i32_24] : memref<8x!tpu.dma_semaphore, #tpu.memory_space<semaphore_mem>> -> memref<1x!tpu.dma_semaphore, #tpu.memory_space<semaphore_mem>>
    %49 = tpu.memref_squeeze %48 : memref<1x!tpu.dma_semaphore, #tpu.memory_space<semaphore_mem>> -> memref<!tpu.dma_semaphore, #tpu.memory_space<semaphore_mem>>
    tpu.enqueue_dma source(%46 : memref<1x64xf32, #tpu.memory_space<any>>) target(%47 : memref<1x64xf32, #tpu.memory_space<vmem>>) target_semaphore(%49 : memref<!tpu.dma_semaphore, #tpu.memory_space<semaphore_mem>>)
    %c7_i32 = arith.constant 7 : i32
    %50 = arith.addi %0, %c7_i32 : i32
    %51 = arith.index_cast %50 : i32 to index
    %52 = memref.load %arg1[%51] : memref<8xi32, #tpu.memory_space<smem>>
    %c7_i32_28 = arith.constant 7 : i32
    %c0_i32_29 = arith.constant 0 : i32
    %53 = tpu.memref_slice %arg2[%52, %c0_i32_29] : memref<17x64xf32, #tpu.memory_space<any>> -> memref<1x64xf32, #tpu.memory_space<any>>
    %c7_i32_30 = arith.constant 7 : i32
    %c0_i32_31 = arith.constant 0 : i32
    %54 = tpu.memref_slice %arg6[%c7_i32_30, %c0_i32_31] : memref<8x64xf32, #tpu.memory_space<vmem>> -> memref<1x64xf32, #tpu.memory_space<vmem>>
    %55 = tpu.memref_slice %arg7[%c7_i32_28] : memref<8x!tpu.dma_semaphore, #tpu.memory_space<semaphore_mem>> -> memref<1x!tpu.dma_semaphore, #tpu.memory_space<semaphore_mem>>
    %56 = tpu.memref_squeeze %55 : memref<1x!tpu.dma_semaphore, #tpu.memory_space<semaphore_mem>> -> memref<!tpu.dma_semaphore, #tpu.memory_space<semaphore_mem>>
    tpu.enqueue_dma source(%53 : memref<1x64xf32, #tpu.memory_space<any>>) target(%54 : memref<1x64xf32, #tpu.memory_space<vmem>>) target_semaphore(%56 : memref<!tpu.dma_semaphore, #tpu.memory_space<semaphore_mem>>)
    %c0_i32_32 = arith.constant 0 : i32
    %c8_i32_33 = arith.constant 8 : i32
    %57 = arith.addi %c0_i32_32, %c8_i32_33 : i32
    %c1_i32_34 = arith.constant 1 : i32
    scf.for %arg8 = %c0_i32_32 to %57 step %c1_i32_34  : i32 {
      %c8_i32_43 = arith.constant 8 : i32
      %c0_i32_44 = arith.constant 0 : i32
      %65 = arith.cmpi eq, %c8_i32_43, %c0_i32_44 : i32
      %c1_i32_45 = arith.constant 1 : i32
      %66 = arith.select %65, %c1_i32_45, %c8_i32_43 : i32
      %67 = arith.remsi %arg8, %66 : i32
      %c0_i32_46 = arith.constant 0 : i32
      %68 = arith.cmpi ne, %67, %c0_i32_46 : i32
      %c0_i32_47 = arith.constant 0 : i32
      %69 = arith.cmpi slt, %67, %c0_i32_47 : i32
      %c0_i32_48 = arith.constant 0 : i32
      %70 = arith.cmpi slt, %66, %c0_i32_48 : i32
      %71 = arith.xori %69, %70 : i1
      %72 = arith.andi %71, %68 : i1
      %73 = arith.addi %67, %66 : i32
      %74 = arith.select %72, %73, %67 : i32
      %c0_i32_49 = arith.constant 0 : i32
      %c0_i32_50 = arith.constant 0 : i32
      %75 = tpu.memref_slice %arg2[%c0_i32_49, %c0_i32_50] : memref<17x64xf32, #tpu.memory_space<any>> -> memref<1x64xf32, #tpu.memory_space<any>>
      %c0_i32_51 = arith.constant 0 : i32
      %76 = tpu.memref_slice %arg6[%arg8, %c0_i32_51] : memref<8x64xf32, #tpu.memory_space<vmem>> -> memref<1x64xf32, #tpu.memory_space<vmem>>
      %77 = tpu.memref_slice %arg7[%74] : memref<8x!tpu.dma_semaphore, #tpu.memory_space<semaphore_mem>> -> memref<1x!tpu.dma_semaphore, #tpu.memory_space<semaphore_mem>>
      %78 = tpu.memref_squeeze %77 : memref<1x!tpu.dma_semaphore, #tpu.memory_space<semaphore_mem>> -> memref<!tpu.dma_semaphore, #tpu.memory_space<semaphore_mem>>
      tpu.wait_dma2 semaphore(%78 : memref<!tpu.dma_semaphore, #tpu.memory_space<semaphore_mem>>) src(%75 : memref<1x64xf32, #tpu.memory_space<any>>) dst(%76 : memref<1x64xf32, #tpu.memory_space<vmem>>)
      %c8_i32_52 = arith.constant 8 : i32
      %79 = arith.addi %arg8, %c8_i32_52 : i32
      %c8_i32_53 = arith.constant 8 : i32
      %80 = arith.cmpi slt, %79, %c8_i32_53 : i32
      %81 = arith.extui %80 : i1 to i32
      %c0_i32_54 = arith.constant 0 : i32
      %82 = arith.cmpi ne, %81, %c0_i32_54 : i32
      scf.if %82 {
        %c8_i32_55 = arith.constant 8 : i32
        %83 = arith.addi %arg8, %c8_i32_55 : i32
        %84 = arith.addi %0, %83 : i32
        %85 = arith.index_cast %84 : i32 to index
        %86 = memref.load %arg1[%85] : memref<8xi32, #tpu.memory_space<smem>>
        %c0_i32_56 = arith.constant 0 : i32
        %87 = tpu.memref_slice %arg2[%86, %c0_i32_56] : memref<17x64xf32, #tpu.memory_space<any>> -> memref<1x64xf32, #tpu.memory_space<any>>
        %c0_i32_57 = arith.constant 0 : i32
        %88 = tpu.memref_slice %arg6[%83, %c0_i32_57] : memref<8x64xf32, #tpu.memory_space<vmem>> -> memref<1x64xf32, #tpu.memory_space<vmem>>
        %89 = tpu.memref_slice %arg7[%74] : memref<8x!tpu.dma_semaphore, #tpu.memory_space<semaphore_mem>> -> memref<1x!tpu.dma_semaphore, #tpu.memory_space<semaphore_mem>>
        %90 = tpu.memref_squeeze %89 : memref<1x!tpu.dma_semaphore, #tpu.memory_space<semaphore_mem>> -> memref<!tpu.dma_semaphore, #tpu.memory_space<semaphore_mem>>
        tpu.enqueue_dma source(%87 : memref<1x64xf32, #tpu.memory_space<any>>) target(%88 : memref<1x64xf32, #tpu.memory_space<vmem>>) target_semaphore(%90 : memref<!tpu.dma_semaphore, #tpu.memory_space<semaphore_mem>>)
      } else {
      }
    }
    %c8_i32_35 = arith.constant 8 : i32
    %c0 = arith.constant 0 : index
    %c0_36 = arith.constant 0 : index
    %58 = vector.load %arg6[%c0, %c0_36] : memref<8x64xf32, #tpu.memory_space<vmem>>, vector<8x64xf32>
    %c0_37 = arith.constant 0 : index
    %c0_38 = arith.constant 0 : index
    %59 = vector.load %arg3[%c0_37, %c0_38] : memref<64x64xf32, #tpu.memory_space<vmem>>, vector<64x64xf32>
    %cst = arith.constant dense<0.000000e+00> : vector<8x64xf32>
    %60 = tpu.matmul %58, %59, %cst {dimension_numbers = #tpu.dot_dimension_numbers<[1], [0], [0], [1], [0, 0, 1, 1], [], []>} : vector<8x64xf32>, vector<64x64xf32>, vector<8x64xf32> -> vector<8x64xf32>
    %c0_39 = arith.constant 0 : index
    %c0_40 = arith.constant 0 : index
    %61 = vector.load %arg4[%c0_39, %c0_40] : memref<1x64xf32, #tpu.memory_space<vmem>>, vector<1x64xf32>
    %62 = vector.broadcast %61 : vector<1x64xf32> to vector<8x64xf32>
    %63 = arith.addf %60, %62 : vector<8x64xf32>
    %c0_41 = arith.constant 0 : index
    %c0_42 = arith.constant 0 : index
    %64 = vector.load %arg5[%c0_41, %c0_42] : memref<8x64xf32, #tpu.memory_space<vmem>>, vector<8x64xf32>
    tpu.vector_store %arg5[%c0_41, %c0_42], %63 {strides = array<i32>} : memref<8x64xf32, #tpu.memory_space<vmem>>, vector<8x64xf32>,
    return
  }
  func.func @transform_1(%arg0: i32, %arg1: memref<8xi32, #tpu.memory_space<smem>>) -> (i32, i32) {
    %c0_i32 = arith.constant 0 : i32
    %c0_i32_0 = arith.constant 0 : i32
    %c0_i32_1 = arith.constant 0 : i32
    return %c0_i32, %c0_i32_0 : i32, i32
  }
  func.func @transform_2(%arg0: i32, %arg1: memref<8xi32, #tpu.memory_space<smem>>) -> (i32, i32) {
    %c0_i32 = arith.constant 0 : i32
    %c0_i32_0 = arith.constant 0 : i32
    %c0_i32_1 = arith.constant 0 : i32
    return %c0_i32, %c0_i32_0 : i32, i32
  }
  func.func @transform_3(%arg0: i32, %arg1: memref<8xi32, #tpu.memory_space<smem>>) -> (i32, i32) {
    %c0_i32 = arith.constant 0 : i32
    %c0_i32_0 = arith.constant 0 : i32
    return %arg0, %c0_i32 : i32, i32
  }
}

</mosaic_0001>

<bundles_post_ra>
// kernel: tpu_custom_call.1
= control target key start
LH: loop header
LB: loop body
LE: loop exit
PB: predicated region body
PF: predicated region fallthrough
CT: control target
= control target key end

     0   :  { %s694_s18 = smov [#allocation5]   ;;  %s883_s0 = inlined_call_operand.hbm [shape: s32[8], index: 0, kind: input, shape index: {}]   ;;  %s884_s1 = inlined_call_operand.hbm [shape: f32[17,64], index: 1, kind: input, shape index: {}]   ;;  %s885_s2 = inlined_call_operand.hbm [shape: f32[64,64], index: 2, kind: input, shape index: {}]   ;;  %s886_s3 = inlined_call_operand.vmem [shape: f32[1,64], index: 3, kind: input, shape index: {}]   ;;  %s887_s4 = inlined_call_operand.hbm [shape: f32[8,64], index: 4, kind: output, shape index: {}]  }
   0x1   :  { %s10_s17 = sshll.u32 %s883_s0, 4  ;;  %s11_s17 = int_to_ptr.hbm [resolvable:$true] %s10_s17 }
   0x2   :  { %13 = dma.hbm_to_smem %s11_s17, 16, %s694_s18, [#allocation4] }
   0x3   :  { %682 = dma.done.wait [#allocation4], 16 }
   0x4   :  { %683 = vsyncadd [#allocation4], 4294967280 }
   0x5   :  { %16 = sfence }
   0x6   :  { %17 = vsyncpa [#allocation7], 0 }
   0x7   :  { %18 = vsyncpa [#allocation8], 0  ;;  %s23_s21 = sshll.u32 %s885_s2, 4  ;;  %s695_s22 = smov [#allocation6]   ;;  %s24_s21 = int_to_ptr.hbm [resolvable:$true] %s23_s21 }
   0x8   :  { %s25_s23 = sshll.u32 %s695_s22, 4  ;;  %s696_s24 = smov 128   ;;  %s26_s23 = int_to_ptr.vmem [resolvable:$true] %s25_s23 }
   0x9   :  { %s697_s25 = smov 8  }
   0xa   :  { %31 = dma.hbm_to_vmem [thread:$0]  %s24_s21, 1024, %s26_s23, [#allocation7], %s696_s24, %s696_s24, %s697_s25  }
   0xb   :  { %684 = dma.done.wait [#allocation7], 1024  }
   0xc   :  { %685 = vsyncadd [#allocation7], 4294966272  ;;  %s39_s0 = sld [smem:[#allocation5]]  ;;  %s698_s26 = smov [#allocation2]  }
   0xd   :  { %s739_s27 = sshll.u32 %s698_s26, 4  ;;  %s351_s28 = sld [smem:[#allocation5 + $0x1]]  ;;  %s51_s27 = int_to_ptr.vmem [resolvable:$true] %s739_s27 }
   0xe   :  { %s699_s29 = smov [#allocation2 + $0x1]   ;;  %s744_s2 = sld [smem:[#allocation5 + $0x2]] }
   0xf   :  { %s742_s30 = sshll.u32 %s699_s29, 4  ;;  %s700_s5 = smov [#allocation2 + $0x2]   ;;  %s69_s30 = int_to_ptr.vmem [resolvable:$true] %s742_s30 }
  0x10   :  { %s747_s6 = sshll.u32 %s700_s5, 4  ;;  %s749_s7 = sld [smem:[#allocation5 + $0x3]]  ;;  %s87_s6 = int_to_ptr.vmem [resolvable:$true] %s747_s6 }
  0x11   :  { %s701_s11 = smov [#allocation2 + $0x3]   ;;  %s763_s22 = scalar_lea.hbm %s884_s1, 24 }
  0x12   :  { %s40_s10 = scalar_lea.hbm %s884_s1, %s39_s0  ;;  %s755_s12 = sshll.u32 %s701_s11, 4  ;;  %s105_s12 = int_to_ptr.vmem [resolvable:$true] %s755_s12 }
  0x13   :  { %s48_s13 = sshll.u32 %s40_s10, 4  ;;  %s56_s16 = scalar_lea.hbm %s884_s1, %s351_s28  ;;  %s49_s13 = int_to_ptr.hbm [resolvable:$true] %s48_s13 }
  0x14   :  { %s66_s17 = sshll.u32 %s56_s16, 4  ;;  %s434_s18 = sshra.s32 %s49_s13, 4  ;;  %s435_s18 = int_to_ptr.hbm [resolvable:$true] %s434_s18  ;;  %s67_s17 = int_to_ptr.hbm [resolvable:$true] %s66_s17 }
  0x15   :  { %s436_s19 = scalar_lea.hbm %s435_s18, 1  ;;  %p439_p1 = scmp.lt.s32.totalorder %s435_s18, %s884_s1 }
  0x16   :  { %p437_p0 = scmp.ne.s32.totalorder %s435_s18, %s436_s19  ;;  %p440_p2 = scmp.lt.s32.totalorder %s763_s22, %s436_s19 }
  0x18   :  { %p441_p3 = por %p440_p2, %p439_p1 }
  0x1a   :  { %p442_p4 = pnand %p441_p3, %p437_p0 }
  0x1c   :  { %445 = shalt.err (!%p442_p4)  }
  0x1d   :  { %53 = dma.hbm_to_vmem [thread:$0]  %s49_s13, 16, %s51_s27, [#allocation3] }
  0x1e   :  { %s74_s26 = scalar_lea.hbm %s884_s1, %s744_s2  ;;  %s458_s28 = sshra.s32 %s67_s17, 4  ;;  %s459_s28 = int_to_ptr.hbm [resolvable:$true] %s458_s28 }
  0x1f   :  { %s460_s29 = scalar_lea.hbm %s459_s28, 1  ;;  %p463_p6 = scmp.lt.s32.totalorder %s459_s28, %s884_s1 }
  0x20   :  { %p461_p5 = scmp.ne.s32.totalorder %s459_s28, %s460_s29  ;;  %p464_p7 = scmp.lt.s32.totalorder %s763_s22, %s460_s29 }
  0x22   :  { %p465_p8 = por %p464_p7, %p463_p6 }
  0x24   :  { %p466_p9 = pnand %p465_p8, %p461_p5 }
  0x26   :  { %469 = shalt.err (!%p466_p9)  }
  0x27   :  { %71 = dma.hbm_to_vmem [thread:$0]  %s67_s17, 16, %s69_s30, [#allocation3 + $0x1] }
  0x28   :  { %s84_s27 = sshll.u32 %s74_s26, 4  ;;  %s92_s10 = scalar_lea.hbm %s884_s1, %s749_s7  ;;  %s85_s27 = int_to_ptr.hbm [resolvable:$true] %s84_s27 }
  0x29   :  { %s102_s11 = sshll.u32 %s92_s10, 4  ;;  %s482_s13 = sshra.s32 %s85_s27, 4  ;;  %s483_s13 = int_to_ptr.hbm [resolvable:$true] %s482_s13  ;;  %s103_s11 = int_to_ptr.hbm [resolvable:$true] %s102_s11 }
  0x2a   :  { %s484_s14 = scalar_lea.hbm %s483_s13, 1  ;;  %p487_p11 = scmp.lt.s32.totalorder %s483_s13, %s884_s1 }
  0x2b   :  { %p485_p10 = scmp.ne.s32.totalorder %s483_s13, %s484_s14  ;;  %p488_p12 = scmp.lt.s32.totalorder %s763_s22, %s484_s14 }
  0x2d   :  { %p489_p13 = por %p488_p12, %p487_p11 }
  0x2f   :  { %p490_p0 = pnand %p489_p13, %p485_p10 }
  0x31   :  { %493 = shalt.err (!%p490_p0)  }
  0x32   :  { %89 = dma.hbm_to_vmem [thread:$0]  %s85_s27, 16, %s87_s6, [#allocation3 + $0x2] }
  0x33   :  { %s506_s30 = sshra.s32 %s103_s11, 4  ;;  %s507_s30 = int_to_ptr.hbm [resolvable:$true] %s506_s30 }
  0x34   :  { %s508_s7 = scalar_lea.hbm %s507_s30, 1  ;;  %p511_p2 = scmp.lt.s32.totalorder %s507_s30, %s884_s1 }
  0x35   :  { %p509_p1 = scmp.ne.s32.totalorder %s507_s30, %s508_s7  ;;  %p512_p3 = scmp.lt.s32.totalorder %s763_s22, %s508_s7 }
  0x37   :  { %p513_p4 = por %p512_p3, %p511_p2 }
  0x39   :  { %p514_p5 = pnand %p513_p4, %p509_p1 }
  0x3b   :  { %517 = shalt.err (!%p514_p5)  }
  0x3c   :  { %107 = dma.hbm_to_vmem [thread:$0]  %s103_s11, 16, %s105_s12, [#allocation3 + $0x3] }
  0x3d   :  { %s354_s19 = sld [smem:[#allocation5 + $0x4]]  ;;  %s702_s20 = smov [#allocation2 + $0x4]  }
  0x3e   :  { %s122_s21 = sshll.u32 %s702_s20, 4  ;;  %s355_s23 = sld [smem:[#allocation5 + $0x5]]  ;;  %s123_s21 = int_to_ptr.vmem [resolvable:$true] %s122_s21 }
  0x3f   :  { %s703_s6 = smov [#allocation2 + $0x5]   ;;  %s796_s25 = sld [smem:[#allocation5 + $0x6]] }
  0x40   :  { %s794_s24 = sshll.u32 %s703_s6, 4  ;;  %s704_s0 = smov [#allocation2 + $0x6]   ;;  %s141_s24 = int_to_ptr.vmem [resolvable:$true] %s794_s24 }
  0x41   :  { %s799_s26 = sshll.u32 %s704_s0, 4  ;;  %s801_s28 = sld [smem:[#allocation5 + $0x7]]  ;;  %s159_s26 = int_to_ptr.vmem [resolvable:$true] %s799_s26 }
  0x43   :  { %s110_s5 = scalar_lea.hbm %s884_s1, %s354_s19 }
  0x44   :  { %s120_s8 = sshll.u32 %s110_s5, 4  ;;  %s128_s2 = scalar_lea.hbm %s884_s1, %s355_s23  ;;  %s121_s8 = int_to_ptr.hbm [resolvable:$true] %s120_s8 }
  0x45   :  { %s138_s10 = sshll.u32 %s128_s2, 4  ;;  %s530_s11 = sshra.s32 %s121_s8, 4  ;;  %s531_s11 = int_to_ptr.hbm [resolvable:$true] %s530_s11  ;;  %s139_s10 = int_to_ptr.hbm [resolvable:$true] %s138_s10 }
  0x46   :  { %s532_s13 = scalar_lea.hbm %s531_s11, 1  ;;  %p535_p7 = scmp.lt.s32.totalorder %s531_s11, %s884_s1 }
  0x47   :  { %p533_p6 = scmp.ne.s32.totalorder %s531_s11, %s532_s13  ;;  %p536_p8 = scmp.lt.s32.totalorder %s763_s22, %s532_s13 }
  0x49   :  { %p537_p9 = por %p536_p8, %p535_p7 }
  0x4b   :  { %p538_p10 = pnand %p537_p9, %p533_p6 }
  0x4d   :  { %541 = shalt.err (!%p538_p10)  }
  0x4e   :  { %125 = dma.hbm_to_vmem [thread:$0]  %s121_s8, 16, %s123_s21, [#allocation3 + $0x4] }
  0x4f   :  { %s146_s7 = scalar_lea.hbm %s884_s1, %s796_s25  ;;  %s554_s17 = sshra.s32 %s139_s10, 4  ;;  %s555_s17 = int_to_ptr.hbm [resolvable:$true] %s554_s17 }
  0x50   :  { %s556_s18 = scalar_lea.hbm %s555_s17, 1  ;;  %p559_p12 = scmp.lt.s32.totalorder %s555_s17, %s884_s1 }
  0x51   :  { %p557_p11 = scmp.ne.s32.totalorder %s555_s17, %s556_s18  ;;  %p560_p13 = scmp.lt.s32.totalorder %s763_s22, %s556_s18 }
  0x53   :  { %p561_p0 = por %p560_p13, %p559_p12 }
  0x55   :  { %p562_p1 = pnand %p561_p0, %p557_p11 }
  0x57   :  { %565 = shalt.err (!%p562_p1)  }
  0x58   :  { %143 = dma.hbm_to_vmem [thread:$0]  %s139_s10, 16, %s141_s24, [#allocation3 + $0x5] }
  0x59   :  { %s156_s21 = sshll.u32 %s146_s7, 4  ;;  %s164_s25 = scalar_lea.hbm %s884_s1, %s801_s28  ;;  %s157_s21 = int_to_ptr.hbm [resolvable:$true] %s156_s21 }
  0x5a   :  { %s174_s0 = sshll.u32 %s164_s25, 4  ;;  %s578_s12 = sshra.s32 %s157_s21, 4  ;;  %s579_s12 = int_to_ptr.hbm [resolvable:$true] %s578_s12  ;;  %s175_s0 = int_to_ptr.hbm [resolvable:$true] %s174_s0 }
  0x5b   :  { %s580_s29 = scalar_lea.hbm %s579_s12, 1  ;;  %p583_p3 = scmp.lt.s32.totalorder %s579_s12, %s884_s1 }
  0x5c   :  { %p581_p2 = scmp.ne.s32.totalorder %s579_s12, %s580_s29  ;;  %p584_p4 = scmp.lt.s32.totalorder %s763_s22, %s580_s29 }
  0x5e   :  { %p585_p5 = por %p584_p4, %p583_p3 }
  0x60   :  { %p586_p6 = pnand %p585_p5, %p581_p2 }
  0x62   :  { %589 = shalt.err (!%p586_p6)  }
  0x63   :  { %161 = dma.hbm_to_vmem [thread:$0]  %s157_s21, 16, %s159_s26, [#allocation3 + $0x6] }
  0x64   :  { %s705_s24 = smov [#allocation2 + $0x7]   ;;  %s602_s27 = sshra.s32 %s175_s0, 4  ;;  %s603_s27 = int_to_ptr.hbm [resolvable:$true] %s602_s27 }
  0x65   :  { %s176_s28 = sshll.u32 %s705_s24, 4  ;;  %s604_s9 = scalar_lea.hbm %s603_s27, 1  ;;  %s177_s28 = int_to_ptr.vmem [resolvable:$true] %s176_s28 }
  0x66   :  { %p605_p7 = scmp.ne.s32.totalorder %s603_s27, %s604_s9  ;;  %p607_p8 = scmp.lt.s32.totalorder %s603_s27, %s884_s1 }
  0x67   :  { %p608_p9 = scmp.lt.s32.totalorder %s763_s22, %s604_s9 }
  0x69   :  { %p609_p10 = por %p608_p9, %p607_p8 }
  0x6b   :  { %p610_p11 = pnand %p609_p10, %p605_p7 }
  0x6d   :  { %613 = shalt.err (!%p610_p11)  }
  0x6e   :  { %179 = dma.hbm_to_vmem [thread:$0]  %s175_s0, 16, %s177_s28, [#allocation3 + $0x7] }
  0x6f   :  { %s838_s11 = smov 0  }
  0x70 LB: > { %p186_p12 = scmp.lt.s32.totalorder %s692_s11, 0  ;;  %s187_s26 = ssub.s32 0, %s692_s11  ;;  %s692_s11 = sphi %s838_s11, %s185_s11  }
  0x71   : > { %s358_s13 = smin.u32 %s692_s11, %s187_s26 }
  0x72   : > { %s189_s14 = sand.u32 7, %s358_s13  }
  0x73   : > { %s190_s15 = ssub.s32 0, %s189_s14 }
  0x74   : > { %s890_s15 = smov (!%p186_p12, %s190_s15), %s189_s14 }
  0x75   : > { %p360_p13 = scmp.lt.s32.totalorder %s890_s15, 0  ;;  %s196_s16 = sadd.s32 8, %s890_s15 }
  0x77   : > { %s892_s16 = smov (!%p360_p13, %s196_s16), %s890_s15 }
  0x78   : > { %s846_s30 = scalar_lea.sflag [#allocation3], %s892_s16 }
  0x79   : > { %686 = dma.done.wait %s846_s30, 16 }
  0x7a   : > { %687 = vsyncadd %s846_s30, 4294967280  ;;  %s202_s7 = sadd.s32 8, %s692_s11  ;;  %s344_s20 = scalar_lea.vmem [#allocation2], %s692_s11 }
  0x7b   : > { %p851_p0 = scmp.lt.s32.totalorder %s202_s7, 8  ;;  %s345_s21 = scalar_lea.vmem %s344_s20, 8 [#allocation2] }
  0x7c   : > { %s220_s23 = sshll.u32 %s345_s21, 4  ;;  %s221_s23 = int_to_ptr.vmem [resolvable:$true] %s220_s23 }
  0x7d   : > { %s372_s18 = scalar_select %p851_p0, [#allocation5], [#allocation30] }
  0x7e   : > { %s894_s7 = smov (!%p851_p0, %s202_s7), 0 }
  0x7f   : > { %s208_s19 = sld [smem:[%s372_s18 + %s894_s7]] }
  0x85   : > { %s209_s0 = scalar_lea.hbm %s884_s1, %s208_s19 }
  0x86   : > { %s218_s12 = sshll.u32 %s209_s0, 4  ;;  %s219_s12 = int_to_ptr.hbm [resolvable:$true] %s218_s12 }
  0x87   : > { %s626_s29 = sshra.s32 %s219_s12, 4  ;;  %s627_s29 = int_to_ptr.hbm [resolvable:$true] %s626_s29 }
  0x88   : > { %s628_s5 = scalar_lea.hbm %s627_s29, 1  ;;  %p633_p4 = scmp.lt.s32.totalorder %s627_s29, %s884_s1 }
  0x89   : > { %p629_p1 = scmp.ne.s32.totalorder %s627_s29, %s628_s5  ;;  %p634_p5 = scmp.lt.s32.totalorder %s763_s22, %s628_s5 }
  0x8b   : > { %p630_p2 = pnand %p629_p1, %p851_p0  ;;  %p635_p6 = por %p634_p5, %p633_p4 }
  0x8d   : > { %p631_p3 = pneg %p630_p2 }
  0x8f   : > { %p636_p7 = pnand %p635_p6, %p631_p3 }
  0x91   : > { %639 = shalt.err (!%p636_p7)  }
  0x92   : > { %s640_s28 = sshra.s32 %s221_s23, 4  ;;  %s706_s9 = smov [#allocation2]   ;;  %s641_s28 = int_to_ptr.vmem [resolvable:$true] %s640_s28 }
  0x93   : > { %s642_s27 = scalar_lea.vmem %s641_s28, 1  ;;  %s646_s2 = scalar_lea.vmem %s706_s9, 8 }
  0x94   : > { %p643_p8 = scmp.ne.s32.totalorder %s641_s28, %s642_s27  ;;  %p647_p11 = scmp.lt.s32.totalorder %s641_s28, [#allocation2] }
  0x95   : > { %p648_p12 = scmp.lt.s32.totalorder %s646_s2, %s642_s27 }
  0x96   : > { %p644_p9 = pnand %p643_p8, %p851_p0 }
  0x97   : > { %p649_p13 = por %p648_p12, %p647_p11 }
  0x98   : > { %p645_p10 = pneg %p644_p9 }
  0x9a   : > { %p650_p1 = pnand %p649_p13, %p645_p10 }
  0x9c   : > { %653 = shalt.err (!%p650_p1)  }
  0x9d   : > { %374 = dma.hbm_to_vmem [thread:$0]  (%p851_p0), %s219_s12, 16, %s221_s23, %s846_s30 }
  0x9e   : > { %s185_s11 = sadd.s32 1, %s692_s11  }
  0x9f   : > { %p182_p2 = scmp.ge.s32.totalorder %s185_s11, 8  }
  0xa0   :  { %v232_v0 = vld [vmem:[#allocation6 + $0x38] sm:$0xff] (%p182_p2)  ;;  %v231_v1 = vld [vmem:[#allocation6 + $0x30] sm:$0xff] (%p182_p2)  ;;  %v230_v2 = vld [vmem:[#allocation6 + $0x28] sm:$0xff] (%p182_p2)  ;;  %vm237_vm0 = vcmask (%p182_p2), 523264   ;;  %s707_s22 = smov (%p182_p2), [#allocation9]   ;;  %s269_s14 = sshll.u32 (%p182_p2), %s887_s4, 4  ;;  %s270_s14 = int_to_ptr.hbm [resolvable:$true] %s269_s14 }
  0xa1   :  { %184 = sbr.rel (!%p182_p2) target bundleno = 112 (0x70), region = 111  ;;  %249 = vmatpush.msra.mxu0 (%p182_p2), %v232_v0  ;;  %v229_v3 = vld [vmem:[#allocation6 + $0x20] sm:$0xff] (%p182_p2)  ;;  %v228_v4 = vld [vmem:[#allocation6 + $0x18] sm:$0xff] (%p182_p2)  ;;  %v227_v5 = vld [vmem:[#allocation6 + $0x10] sm:$0xff] (%p182_p2)  ;;  %s267_s11 = sshll.u32 (%p182_p2), %s707_s22, 4  ;;  %s268_s11 = int_to_ptr.vmem [resolvable:$true] %s267_s11 }
  0xa2   :  { %v226_v6 = vld [vmem:[#allocation6 + $0x8] sm:$0xff] (%p182_p2)  ;;  %v225_v7 = vld [vmem:[#allocation6] sm:$0xff] (%p182_p2)  ;;  %v224_v8 = vld [vmem:[#allocation2] sm:$0xff] (%p182_p2) }
  0xa3   :  { %250 = vmatpush.msra.mxu0 (%p182_p2), %v231_v1  ;;  %v397_v9 = vld [vmem:[%s886_s3] ss:$0 sm:$0xff] (%p182_p2) }
  0xa5   :  { %251 = vmatpush.msra.mxu0 (%p182_p2), %v230_v2 }
  0xa7   :  { %252 = vmatpush.msra.mxu0 %v229_v3 }
  0xa9   :  { %253 = vmatpush.msra.mxu0 %v228_v4 }
  0xab   :  { %254 = vmatpush.msra.mxu0 %v227_v5 }
  0xad   :  { %255 = vmatpush.msra.mxu0 %v226_v6 }
  0xaf   :  { %256 = vmatpush.msra.mxu0 %v225_v7 }
  0xb0   :  { %362 = vmatmul.msk.f32.vlgmr.msra.gmra.mxu0 %vm237_vm0, %v224_v8 }
 0x12d   :  { %v258_v10 = vpop.f32.mrf.mxu0 }
 0x12e   :  { %v259_v11 = vadd.f32 %v397_v9, %v258_v10 }
 0x130   :  { %261 = vst.msk [vmem:[#allocation9] sm:$0xff] %vm237_vm0, %v259_v11 }
 0x131   :  { %272 = dma.vmem_to_hbm [thread:$0]  %s268_s11, 128, %s270_s14, [#allocation8]  }
 0x132   :  { %688 = dma.done.wait [#allocation8], 128  }
 0x133   :  { %689 = vsyncadd [#allocation8], 4294967168 }
 0x134   :  { %277 = vsyncpa [#allocation7], 1 }
 0x135   :  { %278 = vsyncpa [#allocation8], 1 }
 0x136   :  { %279 = vsyncmov [#allocation3] }
 0x139   :  { %s280_s15 = vpop.sfrf %279 }
 0x13a   :  { %p363_p0 = scmp.ne.s32.totalorder %s280_s15, 0 }
 0x13c   :  { %284 = shalt.err (%p363_p0)  }
 0x13d   :  { %286 = vsyncmov [#allocation3 + $0x1] }
 0x140   :  { %s287_s3 = vpop.sfrf %286 }
 0x141   :  { %p364_p3 = scmp.ne.s32.totalorder %s287_s3, 0 }
 0x143   :  { %291 = shalt.err (%p364_p3)  }
 0x144   :  { %293 = vsyncmov [#allocation3 + $0x2] }
 0x147   :  { %s294_s4 = vpop.sfrf %293 }
 0x148   :  { %p365_p4 = scmp.ne.s32.totalorder %s294_s4, 0 }
 0x14a   :  { %298 = shalt.err (%p365_p4)  }
 0x14b   :  { %300 = vsyncmov [#allocation3 + $0x3] }
 0x14e   :  { %s301_s16 = vpop.sfrf %300 }
 0x14f   :  { %p366_p5 = scmp.ne.s32.totalorder %s301_s16, 0 }
 0x151   :  { %305 = shalt.err (%p366_p5)  }
 0x152   :  { %307 = vsyncmov [#allocation3 + $0x4] }
 0x155   :  { %s308_s30 = vpop.sfrf %307 }
 0x156   :  { %p367_p6 = scmp.ne.s32.totalorder %s308_s30, 0 }
 0x158   :  { %312 = shalt.err (%p367_p6)  }
 0x159   :  { %314 = vsyncmov [#allocation3 + $0x5] }
 0x15c   :  { %s315_s7 = vpop.sfrf %314 }
 0x15d   :  { %p368_p7 = scmp.ne.s32.totalorder %s315_s7, 0 }
 0x15f   :  { %319 = shalt.err (%p368_p7)  }
 0x160   :  { %321 = vsyncmov [#allocation3 + $0x6] }
 0x163   :  { %s322_s17 = vpop.sfrf %321 }
 0x164   :  { %p369_p8 = scmp.ne.s32.totalorder %s322_s17, 0 }
 0x166   :  { %326 = shalt.err (%p369_p8)  }
 0x167   :  { %328 = vsyncmov [#allocation3 + $0x7] }
 0x16a   :  { %s329_s18 = vpop.sfrf %328 }
 0x16b   :  { %p370_p9 = scmp.ne.s32.totalorder %s329_s18, 0 }
 0x16d   :  { %333 = shalt.err (%p370_p9)  }

</bundles_post_ra>
